<compile_context>
chip_gen: v7x
topology: tpu7x:2x2x1
jax: 0.10.0
libtpu: 0.0.40
codegen_flags: <defaults>
</compile_context>

<pallas_src>
import functools

import jax
import jax.numpy as jnp
from jax.experimental import pallas as pl
from jax.experimental.pallas import tpu as pltpu

_LANE = 128     # lanes per vreg row
_GROUP = 8      # f32 sublane group processed per inner iteration
_LTILE = 32     # int8 sublane tile; spatial blocks are multiples of 32 rows


def _floor32(x):
    return (x // _LTILE) * _LTILE


def _dice_kernel(pred_ref, lab_ref, out_ref, inter_acc, card_acc, *,
                 hw, sub, num_classes, masked):
    """One (n, s) grid step: accumulate per-class intersection / cardinality."""
    s = pl.program_id(1)

    @pl.when(s == 0)
    def _init():
        inter_acc[...] = jnp.zeros_like(inter_acc)
        card_acc[...] = jnp.zeros_like(card_acc)

    # Loop-invariant iotas hoisted out of the inner loop (JAX does not CSE them).
    cls = jax.lax.broadcasted_iota(jnp.int32, (num_classes, _GROUP, _LANE), 0)
    if masked:
        pix_base = (jax.lax.broadcasted_iota(jnp.int32, (_GROUP, _LANE), 0) * _LANE
                    + jax.lax.broadcasted_iota(jnp.int32, (_GROUP, _LANE), 1))
    row0 = s * sub                       # first global 128-px row of this block

    def group32(j, carry):
        inter_p, card_p = carry
        # one aligned (32, 128) int8 label tile, widened once (leading-dim index)
        lab32 = lab_ref[0, j].astype(jnp.int32)
        for k in range(_LTILE // _GROUP):
            g8 = j * (_LTILE // _GROUP) + k                # 8-row group in block
            p = pred_ref[0, :, g8].astype(jnp.float32)     # (C, 8, 128)
            lab = lab32[k * _GROUP:(k + 1) * _GROUP, :]    # (8, 128)
            # softmax over the class axis: elementwise across dense 8x128 slabs
            m = jnp.max(p, axis=0, keepdims=True)
            e = jnp.exp(p - m)
            denom = jnp.sum(e, axis=0, keepdims=True)
            sm = e * pl.reciprocal(denom, approx=True)     # EUP; ~1e-4 rel error
            hit = cls == lab[None, :, :]                   # in-kernel one-hot
            if masked:
                # mask padded / out-of-bounds tail pixels (global index >= HW)
                pix = pix_base + (row0 + j * _LTILE + k * _GROUP) * _LANE
                valid = (pix < hw)[None, :, :]
                hit = jnp.logical_and(hit, valid)
                sm = jnp.where(valid, sm, 0.0)
            oh = hit.astype(jnp.float32)
            inter_p = inter_p + sm * oh
            card_p = card_p + sm + oh
        return inter_p, card_p

    zeros = jnp.zeros((num_classes, _GROUP, _LANE), jnp.float32)
    inter_p, card_p = jax.lax.fori_loop(0, sub // _LTILE, group32, (zeros, zeros))
    # single accumulator update per grid step (VMEM scratch decoupled from `sub`)
    inter_acc[...] += inter_p
    card_acc[...] += card_p

    @pl.when(s == pl.num_programs(1) - 1)
    def _finalize():
        inter = jnp.sum(jnp.sum(inter_acc[...], axis=2), axis=1)    # (C,)
        card = jnp.sum(jnp.sum(card_acc[...], axis=2), axis=1)      # (C,)
        out_ref[0, 0, :] = inter
        out_ref[0, 1, :] = card


def dice_loss_from_labels(predictions, labels, weights=None, *,
                          max_sub=1024, vmem_limit_bytes=None):
    """predictions: (N, C, H, W) float (f32 or bf16, streamed as-is);
    labels: (N, H, W) integer class ids; weights: (C,) or None (module default)."""
    N, C, H, W = predictions.shape
    HW = H * W
    pred_dtype = predictions.dtype
    lab_dtype = jnp.int8 if C <= 127 else jnp.int32

    # ---- per-generation VMEM budget & spatial tile selection -----------------
    if vmem_limit_bytes is None:
        try:
            cap = pltpu.get_tpu_info().vmem_capacity_bytes
        except Exception:
            cap = 64 * 1024 * 1024            # conservative (v7x per-core) fallback
        vmem_limit_bytes = min((cap * 3) // 4, 100 * 1024 * 1024)
    scratch_bytes = 2 * C * _GROUP * _LANE * 4
    per_row = 2 * _LANE * (C * jnp.dtype(pred_dtype).itemsize          # dbl-buffered
                           + jnp.dtype(lab_dtype).itemsize)
    budget = (vmem_limit_bytes * 3) // 4 - scratch_bytes
    sub_cap = max(_LTILE, budget // per_row)

    rows = pl.cdiv(HW, _LANE)                        # 128-px rows of flat spatial
    rows8 = max(pl.cdiv(rows, _GROUP) * _GROUP, _LTILE)
    cap32 = max(_LTILE, min(_floor32(sub_cap), _floor32(max_sub), _floor32(rows8)))
    n_steps = pl.cdiv(rows8, cap32)
    sub = _LTILE * pl.cdiv(pl.cdiv(rows8, n_steps), _LTILE)   # balanced, <= cap32
    masked = (n_steps * sub * _LANE) != HW

    # ---- layout: (N, C, G8, 8, 128) preds / (N, G32, 32, 128) int8 labels ----
    # No dtype cast of predictions (that would be an extra HBM pass); padding
    # only happens when HW is not already whole 8x128 tiles or the image is tiny.
    rows32 = pl.cdiv(rows8, _LTILE) * _LTILE
    p = predictions.reshape(N, C, HW)
    if rows8 * _LANE != HW:
        p = jnp.pad(p, ((0, 0), (0, 0), (0, rows8 * _LANE - HW)))
    p5 = p.reshape(N, C, rows8 // _GROUP, _GROUP, _LANE)
    l = labels.reshape(N, HW).astype(lab_dtype)
    if rows32 * _LANE != HW:
        l = jnp.pad(l, ((0, 0), (0, rows32 * _LANE - HW)))
    l4 = l.reshape(N, rows32 // _LTILE, _LTILE, _LANE)

    kernel = functools.partial(_dice_kernel, hw=HW, sub=sub,
                               num_classes=C, masked=masked)
    # NOTE: on v7x with N == 1 a core-split of the spatial axis would recover the
    # second TensorCore; not done here (batch axis is the parallel axis).
    stats = pl.pallas_call(
        kernel,
        out_shape=jax.ShapeDtypeStruct((N, 2, C), jnp.float32),
        grid_spec=pltpu.PrefetchScalarGridSpec(
            num_scalar_prefetch=0,
            grid=(N, n_steps),
            in_specs=[
                pl.BlockSpec((1, C, sub // _GROUP, _GROUP, _LANE),
                             lambda n, s: (n, 0, s, 0, 0)),
                pl.BlockSpec((1, sub // _LTILE, _LTILE, _LANE),
                             lambda n, s: (n, s, 0, 0)),
            ],
            out_specs=pl.BlockSpec((1, 2, C), lambda n, s: (n, 0, 0)),
            scratch_shapes=[
                pltpu.VMEM((C, _GROUP, _LANE), jnp.float32),   # intersection acc
                pltpu.VMEM((C, _GROUP, _LANE), jnp.float32),   # cardinality acc
            ],
        ),
        compiler_params=pltpu.CompilerParams(
            dimension_semantics=("parallel", "arbitrary"),
            vmem_limit_bytes=int(vmem_limit_bytes),
        ),
    )(p5, l4)

    inter = stats[:, 0, :]
    card = stats[:, 1, :]
    # Same as the PyTorch module: no smoothing term.
    loss_nc = 1.0 - 2.0 * inter / card                        # (N, C)
    if weights is None:
        weights = jnp.array([1.0 if c == 0 else 3.0 for c in range(C)], jnp.float32)
    w = weights.astype(jnp.float32)
    # total = (1/C) * sum_c w_c * mean_n loss[n, c]  ==  sum_{n,c} w_c*loss / (N*C)
    return jnp.sum(loss_nc * w[None, :]) / (N * C)


def dice_loss(predictions, oh_targets, weights=None, **kwargs):
    """Same interface as the PyTorch module: oh_targets is a strict one-hot (N,C,H,W)."""
    # TODO(synk): if soft (non-strict one-hot) targets must be supported, stream the
    # full target tensor instead of recovering integer labels via argmax.
    labels = jnp.argmax(oh_targets, axis=1)
    return dice_loss_from_labels(predictions, labels, weights, **kwargs)


def dice_loss_ref(predictions, oh_targets, weights):
    """Pure-JAX reference matching the PyTorch module semantics exactly."""
    sm = jax.nn.softmax(predictions.astype(jnp.float32), axis=1)
    inter = jnp.sum(sm * oh_targets, axis=(2, 3))
    card = jnp.sum(sm, axis=(2, 3)) + jnp.sum(oh_targets, axis=(2, 3))
    loss = 1.0 - 2.0 * inter / card
    per_class = jnp.mean(loss, axis=0)                        # reduction='mean'
    return jnp.sum(per_class * weights) / weights.shape[0]


if __name__ == "__main__":
    key = jax.random.PRNGKey(0)
    k1, k2, k3, k4 = jax.random.split(key, 4)

    # Case 1: module-sized example (batch=2, classes=4, 16x16), explicit weights.
    # Tiny image -> padded to one 32x128 tile, single spatial step, masked tail.
    N, C, H, W = 2, 4, 16, 16
    preds = jax.random.normal(k1, (N, C, H, W), dtype=jnp.float32)
    labels = jax.random.randint(k2, (N, H, W), 0, C)
    oh_targets = jax.nn.one_hot(labels, C, axis=1, dtype=jnp.float32)
    weights = jnp.array([1.0 if c == 0 else 3.0 for c in range(C)], dtype=jnp.float32)

    out = jax.block_until_ready(dice_loss(preds, oh_targets, weights))
    ref = dice_loss_ref(preds, oh_targets, weights)
    assert jnp.allclose(out, ref, rtol=5e-3, atol=5e-3), (out, ref)

    # Case 2: multi-step spatial grid (max_sub=32 -> 3 steps over 72 rows) with an
    # out-of-bounds masked tail and the weights=None default path; no wrapper pad.
    N2, C2, H2, W2 = 2, 5, 96, 96
    preds2 = jax.random.normal(k3, (N2, C2, H2, W2), dtype=jnp.float32)
    labels2 = jax.random.randint(k4, (N2, H2, W2), 0, C2)
    oh2 = jax.nn.one_hot(labels2, C2, axis=1, dtype=jnp.float32)
    w2 = jnp.array([1.0 if c == 0 else 3.0 for c in range(C2)], dtype=jnp.float32)

    out2 = jax.block_until_ready(dice_loss(preds2, oh2, None, max_sub=32))
    ref2 = dice_loss_ref(preds2, oh2, w2)
    assert jnp.allclose(out2, ref2, rtol=5e-3, atol=5e-3), (out2, ref2)

    print("KERNEL_OK")
</pallas_src>

<mosaic_0001>
module attributes {stable_mosaic.version = 11 : i64} {
  func.func @_dice_kernel(%arg0: i32, %arg1: i32, %arg2: memref<1x4x4x8x128xf32, #tpu.memory_space<vmem>>, %arg3: memref<1x1x32x128xi8, #tpu.memory_space<vmem>>, %arg4: memref<1x2x4xf32, #tpu.memory_space<vmem>>, %arg5: memref<4x8x128xf32, #tpu.memory_space<vmem>>, %arg6: memref<4x8x128xf32, #tpu.memory_space<vmem>>) attributes {dimension_semantics = [#tpu.dimension_semantics<parallel>, #tpu.dimension_semantics<arbitrary>], iteration_bounds = array<i64: 2, 1>, scalar_prefetch = 0 : i64, scratch_operands = 2 : i64, tpu.core_type = #tpu.core_type<tc>, window_params = [{transform_indices = @transform_0, window_bounds = array<i64: 1, 4, 4, 8, 128>}, {transform_indices = @transform_1, window_bounds = array<i64: 1, 1, 32, 128>}, {transform_indices = @transform_2, window_bounds = array<i64: 1, 2, 4>}]} {
    %c0_i32 = arith.constant 0 : i32
    %0 = arith.cmpi eq, %arg1, %c0_i32 : i32
    %1 = arith.extui %0 : i1 to i32
    %c0_i32_0 = arith.constant 0 : i32
    %2 = arith.cmpi ne, %1, %c0_i32_0 : i32
    scf.if %2 {
      %cst_63 = arith.constant 0.000000e+00 : f32
      %184 = vector.broadcast %cst_63 : f32 to vector<4x8x128xf32>
      %c0_64 = arith.constant 0 : index
      %c0_65 = arith.constant 0 : index
      %c0_66 = arith.constant 0 : index
      %185 = vector.load %arg5[%c0_64, %c0_65, %c0_66] : memref<4x8x128xf32, #tpu.memory_space<vmem>>, vector<4x8x128xf32>
      tpu.vector_store %arg5[%c0_64, %c0_65, %c0_66], %184 {strides = array<i32>} : memref<4x8x128xf32, #tpu.memory_space<vmem>>, vector<4x8x128xf32>,
      %cst_67 = arith.constant 0.000000e+00 : f32
      %186 = vector.broadcast %cst_67 : f32 to vector<4x8x128xf32>
      %c0_68 = arith.constant 0 : index
      %c0_69 = arith.constant 0 : index
      %c0_70 = arith.constant 0 : index
      %187 = vector.load %arg6[%c0_68, %c0_69, %c0_70] : memref<4x8x128xf32, #tpu.memory_space<vmem>>, vector<4x8x128xf32>
      tpu.vector_store %arg6[%c0_68, %c0_69, %c0_70], %186 {strides = array<i32>} : memref<4x8x128xf32, #tpu.memory_space<vmem>>, vector<4x8x128xf32>,
    } else {
    }
    %3 = tpu.iota {dimensions = array<i32: 0>} : vector<4x8x128xi32>
    %4 = tpu.iota {dimensions = array<i32: 0>} : vector<8x128xi32>
    %c128_i32 = arith.constant 128 : i32
    %5 = vector.broadcast %c128_i32 : i32 to vector<8x128xi32>
    %6 = arith.muli %4, %5 : vector<8x128xi32>
    %7 = tpu.iota {dimensions = array<i32: 1>} : vector<8x128xi32>
    %8 = arith.addi %6, %7 : vector<8x128xi32>
    %c32_i32 = arith.constant 32 : i32
    %9 = arith.muli %arg1, %c32_i32 : i32
    %cst = arith.constant 0.000000e+00 : f32
    %10 = vector.broadcast %cst : f32 to vector<4x8x128xf32>
    %c0_i32_1 = arith.constant 0 : i32
    %c0 = arith.constant 0 : index
    %11 = arith.index_cast %c0_i32_1 : i32 to index
    %c0_2 = arith.constant 0 : index
    %c0_3 = arith.constant 0 : index
    %12 = vector.load %arg3[%c0, %11, %c0_2, %c0_3] : memref<1x1x32x128xi8, #tpu.memory_space<vmem>>, vector<1x1x32x128xi8>
    %13 = vector.shape_cast %12 : vector<1x1x32x128xi8> to vector<32x128xi8>
    %14 = arith.extsi %13 : vector<32x128xi8> to vector<32x128xi32>
    %c4_i32 = arith.constant 4 : i32
    %15 = arith.muli %c0_i32_1, %c4_i32 : i32
    %c0_i32_4 = arith.constant 0 : i32
    %16 = arith.addi %15, %c0_i32_4 : i32
    %c0_5 = arith.constant 0 : index
    %c0_6 = arith.constant 0 : index
    %17 = arith.index_cast %16 : i32 to index
    %c0_7 = arith.constant 0 : index
    %c0_8 = arith.constant 0 : index
    %18 = vector.load %arg2[%c0_5, %c0_6, %17, %c0_7, %c0_8] : memref<1x4x4x8x128xf32, #tpu.memory_space<vmem>>, vector<1x4x1x8x128xf32>
    %19 = vector.shape_cast %18 : vector<1x4x1x8x128xf32> to vector<4x8x128xf32>
    %20 = vector.extract_strided_slice %14 {offsets = [0, 0], sizes = [8, 128], strides = [1, 1]} : vector<32x128xi32> to vector<8x128xi32>
    %cst_9 = arith.constant dense<0xFF800000> : vector<8x128xf32>
    %21 = vector.multi_reduction <maximumf>, %19, %cst_9 [0] : vector<4x8x128xf32> to vector<8x128xf32>
    %22 = vector.shape_cast %21 : vector<8x128xf32> to vector<1x8x128xf32>
    %23 = vector.broadcast %22 : vector<1x8x128xf32> to vector<4x8x128xf32>
    %24 = arith.subf %19, %23 : vector<4x8x128xf32>
    %25 = math.exp %24 : vector<4x8x128xf32>
    %cst_10 = arith.constant dense<0.000000e+00> : vector<8x128xf32>
    %26 = vector.multi_reduction <add>, %25, %cst_10 [0] : vector<4x8x128xf32> to vector<8x128xf32>
    %27 = vector.shape_cast %26 : vector<8x128xf32> to vector<1x8x128xf32>
    %28 = tpu.reciprocal %27 {approx = true} : vector<1x8x128xf32> -> vector<1x8x128xf32>
    %29 = vector.broadcast %28 : vector<1x8x128xf32> to vector<4x8x128xf32>
    %30 = arith.mulf %25, %29 : vector<4x8x128xf32>
    %31 = vector.shape_cast %20 : vector<8x128xi32> to vector<1x8x128xi32>
    %32 = vector.broadcast %31 : vector<1x8x128xi32> to vector<4x8x128xi32>
    %33 = arith.cmpi eq, %3, %32 : vector<4x8x128xi32>
    %c32_i32_11 = arith.constant 32 : i32
    %34 = arith.muli %c0_i32_1, %c32_i32_11 : i32
    %35 = arith.addi %9, %34 : i32
    %c0_i32_12 = arith.constant 0 : i32
    %36 = arith.addi %35, %c0_i32_12 : i32
    %c128_i32_13 = arith.constant 128 : i32
    %37 = arith.muli %36, %c128_i32_13 : i32
    %38 = vector.broadcast %37 : i32 to vector<8x128xi32>
    %39 = arith.addi %8, %38 : vector<8x128xi32>
    %c256_i32 = arith.constant 256 : i32
    %40 = vector.broadcast %c256_i32 : i32 to vector<8x128xi32>
    %41 = arith.cmpi slt, %39, %40 : vector<8x128xi32>
    %42 = vector.shape_cast %41 : vector<8x128xi1> to vector<1x8x128xi1>
    %43 = vector.broadcast %42 : vector<1x8x128xi1> to vector<4x8x128xi1>
    %44 = arith.andi %33, %43 : vector<4x8x128xi1>
    %cst_14 = arith.constant 0.000000e+00 : f32
    %45 = vector.shape_cast %42 : vector<1x8x128xi1> to vector<1x8x128xi1>
    %46 = vector.broadcast %45 : vector<1x8x128xi1> to vector<4x8x128xi1>
    %47 = vector.broadcast %cst_14 : f32 to vector<4x8x128xf32>
    %48 = arith.select %46, %30, %47 : vector<4x8x128xi1>, vector<4x8x128xf32>
    %49 = arith.extui %44 : vector<4x8x128xi1> to vector<4x8x128xi32>
    %50 = arith.sitofp %49 : vector<4x8x128xi32> to vector<4x8x128xf32>
    %51 = arith.mulf %48, %50 : vector<4x8x128xf32>
    %52 = arith.addf %10, %51 : vector<4x8x128xf32>
    %53 = arith.addf %10, %48 : vector<4x8x128xf32>
    %54 = arith.addf %53, %50 : vector<4x8x128xf32>
    %c4_i32_15 = arith.constant 4 : i32
    %55 = arith.muli %c0_i32_1, %c4_i32_15 : i32
    %c1_i32 = arith.constant 1 : i32
    %56 = arith.addi %55, %c1_i32 : i32
    %c0_16 = arith.constant 0 : index
    %c0_17 = arith.constant 0 : index
    %57 = arith.index_cast %56 : i32 to index
    %c0_18 = arith.constant 0 : index
    %c0_19 = arith.constant 0 : index
    %58 = vector.load %arg2[%c0_16, %c0_17, %57, %c0_18, %c0_19] : memref<1x4x4x8x128xf32, #tpu.memory_space<vmem>>, vector<1x4x1x8x128xf32>
    %59 = vector.shape_cast %58 : vector<1x4x1x8x128xf32> to vector<4x8x128xf32>
    %60 = vector.extract_strided_slice %14 {offsets = [8, 0], sizes = [8, 128], strides = [1, 1]} : vector<32x128xi32> to vector<8x128xi32>
    %cst_20 = arith.constant dense<0xFF800000> : vector<8x128xf32>
    %61 = vector.multi_reduction <maximumf>, %59, %cst_20 [0] : vector<4x8x128xf32> to vector<8x128xf32>
    %62 = vector.shape_cast %61 : vector<8x128xf32> to vector<1x8x128xf32>
    %63 = vector.broadcast %62 : vector<1x8x128xf32> to vector<4x8x128xf32>
    %64 = arith.subf %59, %63 : vector<4x8x128xf32>
    %65 = math.exp %64 : vector<4x8x128xf32>
    %cst_21 = arith.constant dense<0.000000e+00> : vector<8x128xf32>
    %66 = vector.multi_reduction <add>, %65, %cst_21 [0] : vector<4x8x128xf32> to vector<8x128xf32>
    %67 = vector.shape_cast %66 : vector<8x128xf32> to vector<1x8x128xf32>
    %68 = tpu.reciprocal %67 {approx = true} : vector<1x8x128xf32> -> vector<1x8x128xf32>
    %69 = vector.broadcast %68 : vector<1x8x128xf32> to vector<4x8x128xf32>
    %70 = arith.mulf %65, %69 : vector<4x8x128xf32>
    %71 = vector.shape_cast %60 : vector<8x128xi32> to vector<1x8x128xi32>
    %72 = vector.broadcast %71 : vector<1x8x128xi32> to vector<4x8x128xi32>
    %73 = arith.cmpi eq, %3, %72 : vector<4x8x128xi32>
    %c32_i32_22 = arith.constant 32 : i32
    %74 = arith.muli %c0_i32_1, %c32_i32_22 : i32
    %75 = arith.addi %9, %74 : i32
    %c8_i32 = arith.constant 8 : i32
    %76 = arith.addi %75, %c8_i32 : i32
    %c128_i32_23 = arith.constant 128 : i32
    %77 = arith.muli %76, %c128_i32_23 : i32
    %78 = vector.broadcast %77 : i32 to vector<8x128xi32>
    %79 = arith.addi %8, %78 : vector<8x128xi32>
    %c256_i32_24 = arith.constant 256 : i32
    %80 = vector.broadcast %c256_i32_24 : i32 to vector<8x128xi32>
    %81 = arith.cmpi slt, %79, %80 : vector<8x128xi32>
    %82 = vector.shape_cast %81 : vector<8x128xi1> to vector<1x8x128xi1>
    %83 = vector.broadcast %82 : vector<1x8x128xi1> to vector<4x8x128xi1>
    %84 = arith.andi %73, %83 : vector<4x8x128xi1>
    %cst_25 = arith.constant 0.000000e+00 : f32
    %85 = vector.shape_cast %82 : vector<1x8x128xi1> to vector<1x8x128xi1>
    %86 = vector.broadcast %85 : vector<1x8x128xi1> to vector<4x8x128xi1>
    %87 = vector.broadcast %cst_25 : f32 to vector<4x8x128xf32>
    %88 = arith.select %86, %70, %87 : vector<4x8x128xi1>, vector<4x8x128xf32>
    %89 = arith.extui %84 : vector<4x8x128xi1> to vector<4x8x128xi32>
    %90 = arith.sitofp %89 : vector<4x8x128xi32> to vector<4x8x128xf32>
    %91 = arith.mulf %88, %90 : vector<4x8x128xf32>
    %92 = arith.addf %52, %91 : vector<4x8x128xf32>
    %93 = arith.addf %54, %88 : vector<4x8x128xf32>
    %94 = arith.addf %93, %90 : vector<4x8x128xf32>
    %c4_i32_26 = arith.constant 4 : i32
    %95 = arith.muli %c0_i32_1, %c4_i32_26 : i32
    %c2_i32 = arith.constant 2 : i32
    %96 = arith.addi %95, %c2_i32 : i32
    %c0_27 = arith.constant 0 : index
    %c0_28 = arith.constant 0 : index
    %97 = arith.index_cast %96 : i32 to index
    %c0_29 = arith.constant 0 : index
    %c0_30 = arith.constant 0 : index
    %98 = vector.load %arg2[%c0_27, %c0_28, %97, %c0_29, %c0_30] : memref<1x4x4x8x128xf32, #tpu.memory_space<vmem>>, vector<1x4x1x8x128xf32>
    %99 = vector.shape_cast %98 : vector<1x4x1x8x128xf32> to vector<4x8x128xf32>
    %100 = vector.extract_strided_slice %14 {offsets = [16, 0], sizes = [8, 128], strides = [1, 1]} : vector<32x128xi32> to vector<8x128xi32>
    %cst_31 = arith.constant dense<0xFF800000> : vector<8x128xf32>
    %101 = vector.multi_reduction <maximumf>, %99, %cst_31 [0] : vector<4x8x128xf32> to vector<8x128xf32>
    %102 = vector.shape_cast %101 : vector<8x128xf32> to vector<1x8x128xf32>
    %103 = vector.broadcast %102 : vector<1x8x128xf32> to vector<4x8x128xf32>
    %104 = arith.subf %99, %103 : vector<4x8x128xf32>
    %105 = math.exp %104 : vector<4x8x128xf32>
    %cst_32 = arith.constant dense<0.000000e+00> : vector<8x128xf32>
    %106 = vector.multi_reduction <add>, %105, %cst_32 [0] : vector<4x8x128xf32> to vector<8x128xf32>
    %107 = vector.shape_cast %106 : vector<8x128xf32> to vector<1x8x128xf32>
    %108 = tpu.reciprocal %107 {approx = true} : vector<1x8x128xf32> -> vector<1x8x128xf32>
    %109 = vector.broadcast %108 : vector<1x8x128xf32> to vector<4x8x128xf32>
    %110 = arith.mulf %105, %109 : vector<4x8x128xf32>
    %111 = vector.shape_cast %100 : vector<8x128xi32> to vector<1x8x128xi32>
    %112 = vector.broadcast %111 : vector<1x8x128xi32> to vector<4x8x128xi32>
    %113 = arith.cmpi eq, %3, %112 : vector<4x8x128xi32>
    %c32_i32_33 = arith.constant 32 : i32
    %114 = arith.muli %c0_i32_1, %c32_i32_33 : i32
    %115 = arith.addi %9, %114 : i32
    %c16_i32 = arith.constant 16 : i32
    %116 = arith.addi %115, %c16_i32 : i32
    %c128_i32_34 = arith.constant 128 : i32
    %117 = arith.muli %116, %c128_i32_34 : i32
    %118 = vector.broadcast %117 : i32 to vector<8x128xi32>
    %119 = arith.addi %8, %118 : vector<8x128xi32>
    %c256_i32_35 = arith.constant 256 : i32
    %120 = vector.broadcast %c256_i32_35 : i32 to vector<8x128xi32>
    %121 = arith.cmpi slt, %119, %120 : vector<8x128xi32>
    %122 = vector.shape_cast %121 : vector<8x128xi1> to vector<1x8x128xi1>
    %123 = vector.broadcast %122 : vector<1x8x128xi1> to vector<4x8x128xi1>
    %124 = arith.andi %113, %123 : vector<4x8x128xi1>
    %cst_36 = arith.constant 0.000000e+00 : f32
    %125 = vector.shape_cast %122 : vector<1x8x128xi1> to vector<1x8x128xi1>
    %126 = vector.broadcast %125 : vector<1x8x128xi1> to vector<4x8x128xi1>
    %127 = vector.broadcast %cst_36 : f32 to vector<4x8x128xf32>
    %128 = arith.select %126, %110, %127 : vector<4x8x128xi1>, vector<4x8x128xf32>
    %129 = arith.extui %124 : vector<4x8x128xi1> to vector<4x8x128xi32>
    %130 = arith.sitofp %129 : vector<4x8x128xi32> to vector<4x8x128xf32>
    %131 = arith.mulf %128, %130 : vector<4x8x128xf32>
    %132 = arith.addf %92, %131 : vector<4x8x128xf32>
    %133 = arith.addf %94, %128 : vector<4x8x128xf32>
    %134 = arith.addf %133, %130 : vector<4x8x128xf32>
    %c4_i32_37 = arith.constant 4 : i32
    %135 = arith.muli %c0_i32_1, %c4_i32_37 : i32
    %c3_i32 = arith.constant 3 : i32
    %136 = arith.addi %135, %c3_i32 : i32
    %c0_38 = arith.constant 0 : index
    %c0_39 = arith.constant 0 : index
    %137 = arith.index_cast %136 : i32 to index
    %c0_40 = arith.constant 0 : index
    %c0_41 = arith.constant 0 : index
    %138 = vector.load %arg2[%c0_38, %c0_39, %137, %c0_40, %c0_41] : memref<1x4x4x8x128xf32, #tpu.memory_space<vmem>>, vector<1x4x1x8x128xf32>
    %139 = vector.shape_cast %138 : vector<1x4x1x8x128xf32> to vector<4x8x128xf32>
    %140 = vector.extract_strided_slice %14 {offsets = [24, 0], sizes = [8, 128], strides = [1, 1]} : vector<32x128xi32> to vector<8x128xi32>
    %cst_42 = arith.constant dense<0xFF800000> : vector<8x128xf32>
    %141 = vector.multi_reduction <maximumf>, %139, %cst_42 [0] : vector<4x8x128xf32> to vector<8x128xf32>
    %142 = vector.shape_cast %141 : vector<8x128xf32> to vector<1x8x128xf32>
    %143 = vector.broadcast %142 : vector<1x8x128xf32> to vector<4x8x128xf32>
    %144 = arith.subf %139, %143 : vector<4x8x128xf32>
    %145 = math.exp %144 : vector<4x8x128xf32>
    %cst_43 = arith.constant dense<0.000000e+00> : vector<8x128xf32>
    %146 = vector.multi_reduction <add>, %145, %cst_43 [0] : vector<4x8x128xf32> to vector<8x128xf32>
    %147 = vector.shape_cast %146 : vector<8x128xf32> to vector<1x8x128xf32>
    %148 = tpu.reciprocal %147 {approx = true} : vector<1x8x128xf32> -> vector<1x8x128xf32>
    %149 = vector.broadcast %148 : vector<1x8x128xf32> to vector<4x8x128xf32>
    %150 = arith.mulf %145, %149 : vector<4x8x128xf32>
    %151 = vector.shape_cast %140 : vector<8x128xi32> to vector<1x8x128xi32>
    %152 = vector.broadcast %151 : vector<1x8x128xi32> to vector<4x8x128xi32>
    %153 = arith.cmpi eq, %3, %152 : vector<4x8x128xi32>
    %c32_i32_44 = arith.constant 32 : i32
    %154 = arith.muli %c0_i32_1, %c32_i32_44 : i32
    %155 = arith.addi %9, %154 : i32
    %c24_i32 = arith.constant 24 : i32
    %156 = arith.addi %155, %c24_i32 : i32
    %c128_i32_45 = arith.constant 128 : i32
    %157 = arith.muli %156, %c128_i32_45 : i32
    %158 = vector.broadcast %157 : i32 to vector<8x128xi32>
    %159 = arith.addi %8, %158 : vector<8x128xi32>
    %c256_i32_46 = arith.constant 256 : i32
    %160 = vector.broadcast %c256_i32_46 : i32 to vector<8x128xi32>
    %161 = arith.cmpi slt, %159, %160 : vector<8x128xi32>
    %162 = vector.shape_cast %161 : vector<8x128xi1> to vector<1x8x128xi1>
    %163 = vector.broadcast %162 : vector<1x8x128xi1> to vector<4x8x128xi1>
    %164 = arith.andi %153, %163 : vector<4x8x128xi1>
    %cst_47 = arith.constant 0.000000e+00 : f32
    %165 = vector.shape_cast %162 : vector<1x8x128xi1> to vector<1x8x128xi1>
    %166 = vector.broadcast %165 : vector<1x8x128xi1> to vector<4x8x128xi1>
    %167 = vector.broadcast %cst_47 : f32 to vector<4x8x128xf32>
    %168 = arith.select %166, %150, %167 : vector<4x8x128xi1>, vector<4x8x128xf32>
    %169 = arith.extui %164 : vector<4x8x128xi1> to vector<4x8x128xi32>
    %170 = arith.sitofp %169 : vector<4x8x128xi32> to vector<4x8x128xf32>
    %171 = arith.mulf %168, %170 : vector<4x8x128xf32>
    %172 = arith.addf %132, %171 : vector<4x8x128xf32>
    %173 = arith.addf %134, %168 : vector<4x8x128xf32>
    %174 = arith.addf %173, %170 : vector<4x8x128xf32>
    %c1_i32_48 = arith.constant 1 : i32
    %c0_49 = arith.constant 0 : index
    %c0_50 = arith.constant 0 : index
    %c0_51 = arith.constant 0 : index
    %175 = vector.load %arg5[%c0_49, %c0_50, %c0_51] : memref<4x8x128xf32, #tpu.memory_space<vmem>>, vector<4x8x128xf32>
    %176 = arith.addf %175, %172 : vector<4x8x128xf32>
    %c0_52 = arith.constant 0 : index
    %c0_53 = arith.constant 0 : index
    %c0_54 = arith.constant 0 : index
    %177 = vector.load %arg5[%c0_52, %c0_53, %c0_54] : memref<4x8x128xf32, #tpu.memory_space<vmem>>, vector<4x8x128xf32>
    tpu.vector_store %arg5[%c0_52, %c0_53, %c0_54], %176 {strides = array<i32>} : memref<4x8x128xf32, #tpu.memory_space<vmem>>, vector<4x8x128xf32>,
    %c0_55 = arith.constant 0 : index
    %c0_56 = arith.constant 0 : index
    %c0_57 = arith.constant 0 : index
    %178 = vector.load %arg6[%c0_55, %c0_56, %c0_57] : memref<4x8x128xf32, #tpu.memory_space<vmem>>, vector<4x8x128xf32>
    %179 = arith.addf %178, %174 : vector<4x8x128xf32>
    %c0_58 = arith.constant 0 : index
    %c0_59 = arith.constant 0 : index
    %c0_60 = arith.constant 0 : index
    %180 = vector.load %arg6[%c0_58, %c0_59, %c0_60] : memref<4x8x128xf32, #tpu.memory_space<vmem>>, vector<4x8x128xf32>
    tpu.vector_store %arg6[%c0_58, %c0_59, %c0_60], %179 {strides = array<i32>} : memref<4x8x128xf32, #tpu.memory_space<vmem>>, vector<4x8x128xf32>,
    %c0_i32_61 = arith.constant 0 : i32
    %181 = arith.cmpi eq, %arg1, %c0_i32_61 : i32
    %182 = arith.extui %181 : i1 to i32
    %c0_i32_62 = arith.constant 0 : i32
    %183 = arith.cmpi ne, %182, %c0_i32_62 : i32
    scf.if %183 {
      %c0_63 = arith.constant 0 : index
      %c0_64 = arith.constant 0 : index
      %c0_65 = arith.constant 0 : index
      %184 = vector.load %arg5[%c0_63, %c0_64, %c0_65] : memref<4x8x128xf32, #tpu.memory_space<vmem>>, vector<4x8x128xf32>
      %cst_66 = arith.constant dense<0.000000e+00> : vector<4x8xf32>
      %185 = vector.multi_reduction <add>, %184, %cst_66 [2] : vector<4x8x128xf32> to vector<4x8xf32>
      %cst_67 = arith.constant dense<0.000000e+00> : vector<4xf32>
      %186 = vector.multi_reduction <add>, %185, %cst_67 [1] : vector<4x8xf32> to vector<4xf32>
      %c0_68 = arith.constant 0 : index
      %c0_69 = arith.constant 0 : index
      %c0_70 = arith.constant 0 : index
      %187 = vector.load %arg6[%c0_68, %c0_69, %c0_70] : memref<4x8x128xf32, #tpu.memory_space<vmem>>, vector<4x8x128xf32>
      %cst_71 = arith.constant dense<0.000000e+00> : vector<4x8xf32>
      %188 = vector.multi_reduction <add>, %187, %cst_71 [2] : vector<4x8x128xf32> to vector<4x8xf32>
      %cst_72 = arith.constant dense<0.000000e+00> : vector<4xf32>
      %189 = vector.multi_reduction <add>, %188, %cst_72 [1] : vector<4x8xf32> to vector<4xf32>
      %c0_73 = arith.constant 0 : index
      %c0_74 = arith.constant 0 : index
      %c0_75 = arith.constant 0 : index
      %190 = vector.load %arg4[%c0_73, %c0_74, %c0_75] : memref<1x2x4xf32, #tpu.memory_space<vmem>>, vector<1x1x4xf32>
      %191 = vector.shape_cast %190 : vector<1x1x4xf32> to vector<4xf32>
      %192 = vector.shape_cast %186 : vector<4xf32> to vector<1x1x4xf32>
      tpu.vector_store %arg4[%c0_73, %c0_74, %c0_75], %192 {strides = array<i32>} : memref<1x2x4xf32, #tpu.memory_space<vmem>>, vector<1x1x4xf32>,
      %c0_76 = arith.constant 0 : index
      %c1 = arith.constant 1 : index
      %c0_77 = arith.constant 0 : index
      %193 = vector.load %arg4[%c0_76, %c1, %c0_77] : memref<1x2x4xf32, #tpu.memory_space<vmem>>, vector<1x1x4xf32>
      %194 = vector.shape_cast %193 : vector<1x1x4xf32> to vector<4xf32>
      %195 = vector.shape_cast %189 : vector<4xf32> to vector<1x1x4xf32>
      tpu.vector_store %arg4[%c0_76, %c1, %c0_77], %195 {strides = array<i32>} : memref<1x2x4xf32, #tpu.memory_space<vmem>>, vector<1x1x4xf32>,
    } else {
    }
    return
  }
  func.func @transform_0(%arg0: i32, %arg1: i32) -> (i32, i32, i32, i32, i32) {
    %c0_i32 = arith.constant 0 : i32
    %c0_i32_0 = arith.constant 0 : i32
    %c0_i32_1 = arith.constant 0 : i32
    %c0_i32_2 = arith.constant 0 : i32
    return %arg0, %c0_i32, %arg1, %c0_i32_0, %c0_i32_1 : i32, i32, i32, i32, i32
  }
  func.func @transform_1(%arg0: i32, %arg1: i32) -> (i32, i32, i32, i32) {
    %c0_i32 = arith.constant 0 : i32
    %c0_i32_0 = arith.constant 0 : i32
    %c0_i32_1 = arith.constant 0 : i32
    return %arg0, %arg1, %c0_i32, %c0_i32_0 : i32, i32, i32, i32
  }
  func.func @transform_2(%arg0: i32, %arg1: i32) -> (i32, i32, i32) {
    %c0_i32 = arith.constant 0 : i32
    %c0_i32_0 = arith.constant 0 : i32
    %c0_i32_1 = arith.constant 0 : i32
    return %arg0, %c0_i32, %c0_i32_0 : i32, i32, i32
  }
}

</mosaic_0001>

<bundles_post_ra>
// kernel: tpu_custom_call.1
= control target key start
LH: loop header
LB: loop body
LE: loop exit
PB: predicated region body
PF: predicated region fallthrough
CT: control target
= control target key end

     0   :  { %7 = vsyncpa [#allocation5], 0  ;;  %s1655_s0 = inlined_call_operand.hbm [shape: f32[2,4,4,8,128], index: 0, kind: input, shape index: {}]   ;;  %s1656_s1 = inlined_call_operand.hbm [shape: s8[2,1,32,128], index: 1, kind: input, shape index: {}]   ;;  %s1657_s2 = inlined_call_operand.hbm [shape: f32[2,2,4], index: 2, kind: output, shape index: {}]  }
   0x1   :  { %9 = vsyncpa [#allocation5 + $0x1], 0 }
   0x2   :  { %10 = vsyncpa [#allocation8], 0 }
   0x3   :  { %12 = vsyncpa [#allocation8 + $0x1], 0 }
   0x4   :  { %13 = vsyncpa [#allocation6], 0 }
   0x5   :  { %15 = vsyncpa [#allocation6 + $0x1], 0  ;;  %s1093_s9 = smov 0   ;;  %s1095_s10 = smov 0  }
   0x6   :  { %s1097_s11 = smov 0   ;;  %s1099_s12 = smov 0  }
   0x7   :  { %s1101_s13 = smov 0   ;;  %s1103_s14 = smov 0  }
   0x8 LB: > { %s768_s15 = sadd.s32 4294967295, %s1070_s14   ;;  %s769_s16 = sadd.s32 4294967294, %s1070_s14   ;;  %s1070_s14 = sphi %s1103_s14, %s21_s14   ;;  %s1066_s13 = sphi %s1101_s13, %s1730_s13   ;;  %s1062_s12 = sphi %s1099_s12, %s1729_s12   ;;  %s1058_s11 = sphi %s1097_s11, %s1728_s11   ;;  %s1054_s10 = sphi %s1095_s10, %s1727_s10   ;;  %s1050_s9 = sphi %s1093_s9, %s1726_s9  }
   0x9   : > { %s33_s17 = sadd.s32 1, %s1066_s13  ;;  %s42_s18 = sadd.s32 1, %s1058_s11 }
   0xa   : > { %p35_p0 = scmp.ge.s32.totalorder %s33_s17, 2  ;;  %p49_p1 = scmp.ne.s32.totalorder %s1058_s11, %s1054_s10 }
   0xb   : > { %p50_p2 = scmp.eq.s32.totalorder %s1070_s14, 0  ;;  %p55_p3 = scmp.ne.s32.totalorder %s1054_s10, %s1050_s9 }
   0xc   : > { %s1732_s17 = smov (%p35_p0, %s33_s17), 0  ;;  %p56_p5 = scmp.eq.s32.totalorder %s768_s15, 0 }
   0xd   : > { %p1134_p4 = por %p50_p2, %p49_p1  ;;  %s37_s20 = ssub.s32 %s1066_s13, %s1732_s17 }
   0xe   : > { %p107_p6 = scmp.eq.s32.totalorder %s768_s15, 1  ;;  %p40_p7 = scmp.eq.s32.totalorder %s37_s20, 0 }
   0xf   : > { %p1140_p8 = por %p56_p5, %p55_p3  ;;  %p113_p10 = scmp.eq.s32.totalorder %s769_s16, 1 }
  0x10   : > { %p1144_p9 = por %p107_p6, %p49_p1  ;;  %p831_p13 = scmp.lt.s32.totalorder %s1070_s14, 2 }
  0x11   : > { %s1665_s21 = scalar_select %p1140_p8, 1, 0 }
  0x12   : > { %s1666_s22 = scalar_select %p1144_p9, 1, 0 }
  0x13   : > { %s1149_s23 = scalar_select %p40_p7, %s1058_s11, %s42_s18  }
  0x14   : > { %p1151_p11 = por %p113_p10, %p55_p3  ;;  %s1158_s25 = sand.u32 1, %s1058_s11  }
  0x15   : > { %s772_s26 = sshll.u32 %s1158_s25, 7  ;;  %s813_s27 = sshll.u32 %s1066_s13, 11 }
  0x16   : > { %s1667_s24 = scalar_select %p1151_p11, 1, 0 }
  0x17   : > { %s1165_s30 = scalar_lea.hbm %s1655_s0, %s813_s27  ;;  %s137_s3 = scalar_lea.vmem [#allocation4], %s772_s26 }
  0x18   : > { %s146_s4 = sshll.u32 %s137_s3, 4  ;;  %p1171_p0 = pnand %p831_p13, %p1134_p4  ;;  %s1167_s4 = int_to_ptr.vmem [resolvable:$true] %s146_s4 }
  0x19   : > { %s134_s6 = scalar_lea.sflag [#allocation5], %s1158_s25  ;;  %s924_s7 = scalar_lea.hbm %s1165_s30, 2048 }
  0x1a   : > { %p925_p2 = scmp.ne.s32.totalorder %s1165_s30, %s924_s7  ;;  %p926_p3 = pneg %p1171_p0 }
  0x1b   : > { %s929_s16 = scalar_lea.hbm %s1655_s0, 4096  ;;  %p930_p4 = scmp.lt.u32.totalorder %s1165_s30, %s1655_s0 }
  0x1c   : > { %p927_p5 = pnand %p926_p3, %p925_p2  ;;  %p931_p7 = scmp.lt.u32.totalorder %s929_s16, %s924_s7 }
  0x1d   : > { %p933_p13 = scmp.lt.u32.totalorder %s924_s7, %s1165_s30 }
  0x1e   : > { %p928_p6 = pneg %p927_p5  ;;  %p932_p10 = por %p931_p7, %p930_p4 }
  0x20   : > { %p934_p12 = por %p933_p13, %p932_p10 }
  0x22   : > { %p935_p1 = pnand %p934_p12, %p928_p6 }
  0x24   : > { %938 = shalt.err (!%p935_p1)
}
  0x25   : > { %s939_s20 = scalar_lea.vmem %s1167_s4, 2048  ;;  %s1072_s26 = smov [#allocation4]  }
  0x26   : > { %p940_p2 = scmp.ne.s32.totalorder %s1167_s4, %s939_s20  ;;  %s944_s27 = sshll.u32 %s1072_s26, 4  ;;  %s945_s27 = int_to_ptr.vmem [resolvable:$false] %s944_s27 }
  0x27   : > { %s946_s28 = scalar_lea.vmem %s945_s27, 4096  ;;  %p947_p9 = scmp.lt.s32.totalorder %s1167_s4, %s945_s27 }
  0x28   : > { %p942_p5 = pnand %p940_p2, %p926_p3  ;;  %p948_p4 = scmp.lt.s32.totalorder %s946_s28, %s939_s20 }
  0x2a   : > { %p943_p11 = pneg %p942_p5  ;;  %p949_p7 = por %p948_p4, %p947_p9 }
  0x2c   : > { %p950_p10 = pnand %p949_p7, %p943_p11 }
  0x2e   : > { %953 = shalt.err (!%p950_p10)
}
  0x2f   : > { %s1073_s29 = smov 128   ;;  %s1074_s3 = smov 8  }
  0x30   : > { %823 = dma.hbm_to_vmem [thread:$0]  (!%p1171_p0), %s1165_s30, 2048, %s1167_s4, %s134_s6, %s1073_s29, %s1073_s29, %s1074_s3  }
  0x31   : > { %p173_p12 = scmp.lt.s32.totalorder %s1070_s14, 3  ;;  %s775_s7 = sshll.u32 %s1158_s25, 3 }
  0x32   : > { %s776_s8 = sshll.u32 %s1066_s13, 7  ;;  %p1669_p9 = scmp.ge.s32.totalorder %s1070_s14, 1 }
  0x33   : > { %s1216_s19 = scalar_lea.hbm %s1656_s1, %s776_s8  ;;  %s160_s20 = scalar_lea.vmem [#allocation7], %s775_s7 }
  0x34   : > { %p1209_p11 = pnand %p1669_p9, %p173_p12  ;;  %s168_s26 = sshll.u32 %s160_s20, 4  ;;  %s169_s26 = int_to_ptr.vmem [resolvable:$true] %s168_s26 }
  0x35   : > { %s157_s30 = scalar_lea.sflag [#allocation8], %s1158_s25  ;;  %s954_s4 = scalar_lea.hbm %s1216_s19, 128 }
  0x36   : > { %s1670_s15 = scalar_select %p1209_p11, 1, 0 }
  0x37   : > { %p955_p1 = scmp.ne.s32.totalorder %s1216_s19, %s954_s4  ;;  %s959_s28 = scalar_lea.hbm %s1656_s1, 256 }
  0x38   : > { %p960_p2 = scmp.lt.u32.totalorder %s1216_s19, %s1656_s1  ;;  %p961_p5 = scmp.lt.u32.totalorder %s959_s28, %s954_s4 }
  0x39   : > { %p957_p6 = pnand %p955_p1, %p926_p3  ;;  %p963_p7 = scmp.lt.u32.totalorder %s954_s4, %s1216_s19 }
  0x3a   : > { %p962_p4 = por %p961_p5, %p960_p2 }
  0x3b   : > { %p958_p13 = pneg %p957_p6 }
  0x3c   : > { %p964_p10 = por %p963_p7, %p962_p4 }
  0x3e   : > { %p965_p12 = pnand %p964_p10, %p958_p13 }
  0x40   : > { %968 = shalt.err (!%p965_p12)
}
  0x41   : > { %s969_s25 = scalar_lea.vmem %s169_s26, 128  ;;  %s1075_s7 = smov [#allocation7]  }
  0x42   : > { %p970_p9 = scmp.ne.s32.totalorder %s169_s26, %s969_s25  ;;  %s974_s8 = sshll.u32 %s1075_s7, 4  ;;  %s975_s8 = int_to_ptr.vmem [resolvable:$false] %s974_s8 }
  0x43   : > { %s976_s16 = scalar_lea.vmem %s975_s8, 256  ;;  %p977_p8 = scmp.lt.s32.totalorder %s169_s26, %s975_s8 }
  0x44   : > { %p972_p1 = pnand %p970_p9, %p926_p3  ;;  %p978_p11 = scmp.lt.s32.totalorder %s976_s16, %s969_s25 }
  0x46   : > { %p973_p6 = pneg %p972_p1  ;;  %p979_p2 = por %p978_p11, %p977_p8 }
  0x48   : > { %p980_p5 = pnand %p979_p2, %p973_p6 }
  0x4a   : > { %983 = shalt.err (!%p980_p5)
}
  0x4b   : > { %826 = dma.hbm_to_vmem [thread:$0]  (!%p1171_p0), %s1216_s19, 128, %s169_s26, %s157_s30  }
  0x4c   : > { %p1671_p13 = scmp.ne.s32.totalorder %s1670_s15, 0 }
  0x4d   : > { %s1241_s18 = sand.u32 (!%p1671_p13), 1, %s1054_s10   ;;  %p1672_p8 = scmp.ne.s32.totalorder (!%p1671_p13), %s1665_s21, 0 }
  0x4e   : > { %177 = sbr.rel (%p1671_p13) target bundleno = 467 (0x1d3), region = 28  ;;  %s778_s20 = sshll.u32 (!%p1671_p13), %s1241_s18, 7 }
  0x4f   : > { %s180_s4 = scalar_lea.sflag (!%p1671_p13), [#allocation5], %s1241_s18  ;;  %s1245_s6 = scalar_lea.vmem (!%p1671_p13), [#allocation4], %s778_s20 }
  0x55   : > { %1037 = dma.done.wait (%p1672_p8), %s180_s4, 2048  }
  0x56   : > { %1039 = vsyncadd (%p1672_p8), %s180_s4, 4294965248  ;;  %s779_s5 = sshll.u32 %s1241_s18, 3  ;;  %s189_s15 = scalar_lea.sflag [#allocation8], %s1241_s18 }
  0x57   : > { %s1253_s19 = scalar_lea.vmem [#allocation7], %s779_s5 }
  0x58   : > { %1041 = dma.done.wait (%p1672_p8), %s189_s15, 128  }
  0x59   : > { %1043 = vsyncadd (%p1672_p8), %s189_s15, 4294967168  ;;  %v231_v0 = vlaneseq  ;;  %v243_v4 = vld [vmem:[%s1245_s6] sm:$0xff]  ;;  %v785_v8 = vld [vmem:[%s1245_s6 + $0x8] sm:$0xff]  ;;  %s780_s21 = sshll.u32 %s1241_s18, 1  ;;  %s810_s26 = sshll.u32 %s1062_s12, 5 }
  0x5a   : > { %v244_v5 = vld [vmem:[%s1245_s6 + $0x20] sm:$0xff]  ;;  %v786_v11 = vld [vmem:[%s1245_s6 + $0x28] sm:$0xff]  ;;  %v793_v16 = vld [vmem:[%s1245_s6 + $0x10] sm:$0xff]  ;;  %s217_s30 = scalar_lea.vmem [#allocation9], %s780_s21  ;;  %s1606_s3 = scalar_lea.hbm %s1657_s2, %s810_s26 }
  0x5b   : > { %v232_v1 = vshrl.u32 %v231_v0, 7  ;;  %v235_v2 = vand.u32 127, %v231_v0  ;;  %v245_v6 = vld [vmem:[%s1245_s6 + $0x40] sm:$0xff]  ;;  %v247_v9 = vmax.f32 %v243_v4, %v244_v5  ;;  %v787_v12 = vld [vmem:[%s1245_s6 + $0x48] sm:$0xff]  ;;  %v317_v14 = vmax.f32 %v785_v8, %v786_v11  ;;  %v794_v17 = vld [vmem:[%s1245_s6 + $0x30] sm:$0xff]  ;;  %s663_s27 = sshll.u32 %s217_s30, 4  ;;  %s1608_s27 = int_to_ptr.vmem [resolvable:$true] %s663_s27 }
  0x5c   : > { %v246_v7 = vld [vmem:[%s1245_s6 + $0x60] sm:$0xff]  ;;  %v788_v13 = vld [vmem:[%s1245_s6 + $0x68] sm:$0xff]  ;;  %v795_v18 = vld [vmem:[%s1245_s6 + $0x50] sm:$0xff]  ;;  %v388_v21 = vmax.f32 %v793_v16, %v794_v17  ;;  %s650_s12 = scalar_lea.sflag [#allocation6], %s1241_s18  ;;  %s984_s25 = scalar_lea.vmem %s1608_s27, 32 }
  0x5d   : > { %v1259_v3 = vsub.s32 %v235_v2, %v232_v1  ;;  %v248_v10 = vmax.f32 %v245_v6, %v246_v7  ;;  %v318_v15 = vmax.f32 %v787_v12, %v788_v13  ;;  %v796_v20 = vld [vmem:[%s1245_s6 + $0x70] sm:$0xff]  ;;  %v801_v31 = vld [vmem:[%s1245_s6 + $0x18] sm:$0xff]  ;;  %v233_v37 = vmul.u32 128, %v232_v1  ;;  %v238_v57 = vld [vmem:[%s1253_s19] sm:$0xff]  ;;  %p985_p0 = scmp.ne.s32.totalorder %s1608_s27, %s984_s25  ;;  %p1723_p3 = scmp.ne.s32.totalorder %s1666_s22, 0 }
  0x5e   : > { %v389_v23 = vmax.f32 %v795_v18, %v796_v20  ;;  %v802_v32 = vld [vmem:[%s1245_s6 + $0x38] sm:$0xff]  ;;  %v1280_v0 = vunpack.c.0.s8 %v238_v57  ;;  %s1077_s7 = smov [#allocation9]  }
  0x5f   : > { %v249_v19 = vmax.f32 %v247_v9, %v248_v10  ;;  %v319_v22 = vmax.f32 %v317_v14, %v318_v15  ;;  %v803_v40 = vld [vmem:[%s1245_s6 + $0x58] sm:$0xff]  ;;  %v459_v44 = vmax.f32 %v801_v31, %v802_v32  ;;  %v1277_v54 = vadd.s32 %v235_v2, %v233_v37  ;;  %p986_p11 = pnand %p985_p0, %p1723_p3  ;;  %s988_s8 = sshll.u32 %s1077_s7, 4  ;;  %s989_s8 = int_to_ptr.vmem [resolvable:$false] %s988_s8 }
  0x60   : > { %v390_v36 = vmax.f32 %v388_v21, %v389_v23  ;;  %v804_v41 = vld [vmem:[%s1245_s6 + $0x78] sm:$0xff]  ;;  %v1284_v2 = vunpack.c.1.s8 %v238_v57  ;;  %vm270_vm0 = vcmp.eq.s32.totalorder %v1280_v0, 0  ;;  %vm271_vm7 = vcmp.eq.s32.totalorder %v1280_v0, 1  ;;  %s990_s16 = scalar_lea.vmem %s989_s8, 64  ;;  %p991_p7 = scmp.lt.s32.totalorder %s1608_s27, %s989_s8 }
  0x61   : > { %v250_v24 = vsub.f32 %v243_v4, %v249_v19  ;;  %v251_v25 = vsub.f32 %v244_v5, %v249_v19  ;;  %v252_v26 = vsub.f32 %v245_v6, %v249_v19  ;;  %v253_v27 = vsub.f32 %v246_v7, %v249_v19  ;;  %p987_p4 = pneg %p986_p11  ;;  %p992_p10 = scmp.lt.s32.totalorder %s990_s16, %s984_s25 }
  0x62   : > { %v320_v28 = vsub.f32 %v785_v8, %v319_v22  ;;  %v321_v29 = vsub.f32 %v786_v11, %v319_v22  ;;  %v322_v30 = vsub.f32 %v787_v12, %v319_v22  ;;  %v323_v39 = vsub.f32 %v788_v13, %v319_v22 }
  0x63   : > { %v254_v33 = vmul.f32 1.442695, %v250_v24  ;;  %v256_v34 = vmul.f32 1.442695, %v251_v25  ;;  %v258_v35 = vmul.f32 1.442695, %v252_v26  ;;  %v391_v45 = vsub.f32 %v793_v16, %v390_v36  ;;  %p993_p12 = por %p992_p10, %p991_p7 }
  0x64   : > { %v260_v38 = vmul.f32 1.442695, %v253_v27  ;;  %v324_v42 = vmul.f32 1.442695, %v320_v28  ;;  %v326_v43 = vmul.f32 1.442695, %v321_v29  ;;  %v392_v46 = vsub.f32 %v794_v17, %v390_v36 }
  0x65   : > { %884 = vpow2.f32 %v254_v33  ;;  %v393_v47 = vsub.f32 %v795_v18, %v390_v36  ;;  %v328_v48 = vmul.f32 1.442695, %v322_v30  ;;  %v460_v49 = vmax.f32 %v803_v40, %v804_v41  ;;  %p994_p9 = pnand %p993_p12, %p987_p4 }
  0x66   : > { %886 = vpow2.f32 %v256_v34  ;;  %v330_v50 = vmul.f32 1.442695, %v323_v39  ;;  %v394_v51 = vsub.f32 %v796_v20, %v390_v36  ;;  %v395_v52 = vmul.f32 1.442695, %v391_v45 }
  0x67   : > { %888 = vpow2.f32 %v258_v35  ;;  %v461_v53 = vmax.f32 %v459_v44, %v460_v49  ;;  %v397_v55 = vmul.f32 1.442695, %v392_v46  ;;  %v399_v56 = vmul.f32 1.442695, %v393_v47 }
  0x68   : > { %890 = vpow2.f32 %v260_v38  ;;  %v401_v61 = vmul.f32 1.442695, %v394_v51  ;;  %v1287_v5 = vadd.s32 1024, %v1277_v54  ;;  %v1291_v8 = vunpack.c.2.s8 %v238_v57 }
  0x69   : > { %892 = vpow2.f32 %v324_v42  ;;  %v462_v58 = vsub.f32 %v801_v31, %v461_v53  ;;  %v463_v59 = vsub.f32 %v802_v32, %v461_v53  ;;  %v464_v60 = vsub.f32 %v803_v40, %v461_v53 }
  0x6a   : > { %894 = vpow2.f32 %v326_v43  ;;  %v465_v62 = vsub.f32 %v804_v41, %v461_v53  ;;  %v1294_v9 = vadd.s32 2048, %v1277_v54  ;;  %v1298_v12 = vunpack.c.3.s8 %v238_v57 }
  0x6b   : > { %896 = vpow2.f32 %v328_v48  ;;  %v466_v63 = vmul.f32 1.442695, %v462_v58  ;;  %v468_v1 = vmul.f32 1.442695, %v463_v59  ;;  %v470_v6 = vmul.f32 1.442695, %v464_v60 }
  0x6c   : > { %898 = vpow2.f32 %v330_v50  ;;  %v472_v10 = vmul.f32 1.442695, %v465_v62  ;;  %vm1663_vm1 = vcmp.lt.s32.totalorder %v1277_v54, 256  ;;  %v1307_v15 = vadd.s32 3072, %v1277_v54 }
  0x6d   : > { %900 = vpow2.f32 %v395_v52  ;;  %vm340_vm2 = vcmp.eq.s32.totalorder %v1284_v2, 0  ;;  %vm1660_vm3 = vcmp.lt.s32.totalorder %v1287_v5, 256  ;;  %vm411_vm4 = vcmp.eq.s32.totalorder %v1291_v8, 0  ;;  %vm1325_vm6 = vmand %vm270_vm0, %vm1663_vm1 }
  0x6e   : > { %902 = vpow2.f32 %v397_v55  ;;  %vm1662_vm5 = vcmp.lt.s32.totalorder %v1294_v9, 256  ;;  %vm1336_vm8 = vmand %vm340_vm2, %vm1660_vm3  ;;  %vm482_vm9 = vcmp.eq.s32.totalorder %v1298_v12, 0  ;;  %vm1661_vm10 = vcmp.lt.s32.totalorder %v1307_v15, 256 }
  0x6f   : > { %v1282_v4 = vpop.eup %884  ;;  %904 = vpow2.f32 %v399_v56  ;;  %vm1349_vm11 = vmand %vm411_vm4, %vm1662_vm5  ;;  %vm341_vm12 = vcmp.eq.s32.totalorder %v1284_v2, 1  ;;  %vm412_vm14 = vcmp.eq.s32.totalorder %v1291_v8, 1  ;;  %vm483_vm0 = vcmp.eq.s32.totalorder %v1298_v12, 1 }
  0x70   : > { %v1289_v7 = vpop.eup %886  ;;  %906 = vpow2.f32 %v401_v61  ;;  %vm1358_vm13 = vmand %vm271_vm7, %vm1663_vm1  ;;  %vm272_vm4 = vcmp.eq.s32.totalorder %v1280_v0, 2  ;;  %v1689_v44 = vmov 0  ;;  %v1076_v46 = vmov 0.0  }
  0x71   : > { %v1296_v11 = vpop.eup %888  ;;  %v262_v13 = vadd.f32 %v1289_v7, %v1282_v4  ;;  %908 = vpow2.f32 %v466_v63  ;;  %vm1370_vm15 = vmand %vm482_vm9, %vm1661_vm10  ;;  %vm342_vm9 = vcmp.eq.s32.totalorder %v1284_v2, 2  ;;  %v781_v47 = vsel %vm1325_vm6, 1.0, %v1076_v46 }
  0x72   : > { %v1302_v14 = vpop.eup %890  ;;  %910 = vpow2.f32 %v468_v1  ;;  %vm1379_vm2 = vmand %vm341_vm12, %vm1660_vm3  ;;  %vm413_vm3 = vcmp.eq.s32.totalorder %v1291_v8, 2  ;;  %v789_v49 = vsel %vm1336_vm8, 1.0, %v1076_v46  ;;  %vm343_vm6 = vcmp.eq.s32.totalorder %v1284_v2, 3 }
  0x73   : > { %v1309_v16 = vpop.eup %892  ;;  %v263_v17 = vadd.f32 %v1296_v11, %v262_v13  ;;  %912 = vpow2.f32 %v470_v6  ;;  %vm1389_vm7 = vmand %vm412_vm14, %vm1662_vm5  ;;  %v1441_v52 = vsel %vm1349_vm11, 1.0, %v1076_v46  ;;  %v1446_v53 = vsel %vm1370_vm15, 1.0, %v1076_v46 }
  0x74   : > { %v1314_v18 = vpop.eup %894  ;;  %914 = vpow2.f32 %v472_v10  ;;  %vm1398_vm12 = vmand %vm483_vm0, %vm1661_vm10  ;;  %vm484_vm0 = vcmp.eq.s32.totalorder %v1298_v12, 2  ;;  %vm1691_vm10 = vcmp.lt.s32.totalorder %v1287_v5, 256  ;;  %v782_v55 = vsel %vm1358_vm13, 1.0, %v1076_v46 }
  0x75   : > { %v1318_v19 = vpop.eup %896  ;;  %v264_v20 = vadd.f32 %v1302_v14, %v263_v17  ;;  %v332_v22 = vadd.f32 %v1314_v18, %v1309_v16  ;;  %vm1410_vm14 = vmand %vm272_vm4, %vm1663_vm1  ;;  %vm273_vm4 = vcmp.eq.s32.totalorder %v1280_v0, 3  ;;  %vm1694_vm1 = vcmp.lt.s32.totalorder %v1294_v9, 256 }
  0x76   : > { %v1332_v23 = vpop.eup %898  ;;  %v1690_v44 = vsel %vm1410_vm14, 4294967295, %v1689_v44  ;;  %vm1422_vm5 = vmand %vm342_vm9, %vm1691_vm10  ;;  %vm414_vm8 = vcmp.eq.s32.totalorder %v1291_v8, 3  ;;  %v1462_v59 = vsel %vm1379_vm2, 1.0, %v1076_v46  ;;  %v1467_v60 = vsel %vm1389_vm7, 1.0, %v1076_v46 }
  0x77   : > { %v1342_v25 = vpop.eup %900  ;;  %916 = vrcp.f32 %v264_v20  ;;  %v333_v26 = vadd.f32 %v1318_v19, %v332_v22  ;;  %vm1433_vm14 = vmand %vm413_vm3, %vm1694_vm1  ;;  %vm1697_vm1 = vcmp.lt.s32.totalorder %v1307_v15, 256  ;;  %v1472_v61 = vsel %vm1398_vm12, 1.0, %v1076_v46 }
  0x78   : > { %v1354_v28 = vpop.eup %902  ;;  %vm1453_vm3 = vmand %vm484_vm0, %vm1697_vm1  ;;  %vm1700_vm10 = vcmp.lt.s32.totalorder %v1277_v54, 256  ;;  %vm1703_vm13 = vcmp.lt.s32.totalorder %v1287_v5, 256  ;;  %vm1704_vm2 = vnez %v1690_v44  ;;  %vm1705_vm7 = vcmp.lt.s32.totalorder %v1294_v9, 256 }
  0x79   : > { %v1363_v30 = vpop.eup %904  ;;  %v334_v31 = vadd.f32 %v1332_v23, %v333_v26  ;;  %v403_v32 = vadd.f32 %v1354_v28, %v1342_v25  ;;  %vm1478_vm11 = vmand %vm273_vm4, %vm1700_vm10  ;;  %v783_v0 = vsel %vm1704_vm2, 1.0, %v1076_v46 }
  0x7a   : > { %v1375_v34 = vpop.eup %906  ;;  %vm354_vm15 = vmand %vm343_vm6, %vm1703_vm13  ;;  %v784_v21 = vsel %vm1478_vm11, 1.0, %v1076_v46 }
  0x7b   : > { %v1384_v36 = vpop.eup %908  ;;  %918 = vrcp.f32 %v334_v31  ;;  %v404_v37 = vadd.f32 %v1363_v30, %v403_v32  ;;  %vm425_vm9 = vmand %vm414_vm8, %vm1705_vm7  ;;  %v1524_v22 = vsel %vm354_vm15, 1.0, %v1076_v46 }
  0x7c   : > { %v1394_v39 = vpop.eup %910  ;;  %vm1706_vm12 = vmmov %vm1700_vm10  ;;  %v1529_v29 = vsel %vm425_vm9, 1.0, %v1076_v46 }
  0x7d   : > { %v1403_v41 = vpop.eup %912  ;;  %v405_v42 = vadd.f32 %v1375_v34, %v404_v37  ;;  %v474_v43 = vadd.f32 %v1394_v39, %v1384_v36  ;;  %vm1707_vm0 = vmmov %vm1700_vm10 }
  0x7e   : > { %v1415_v45 = vpop.eup %914  ;;  %vm1708_vm4 = vmmov %vm1707_vm0 }
  0x7f   : > { %920 = vrcp.f32 %v405_v42  ;;  %v475_v50 = vadd.f32 %v1403_v41, %v474_v43  ;;  %vm1710_vm6 = vmmov %vm1703_vm13  ;;  %vm1716_vm13 = vcmp.lt.s32.totalorder %v1307_v15, 256 }
  0x80   : > { %vm1711_vm1 = vmmov %vm1710_vm6 }
  0x81   : > { %v917_v57 = vpop.eup %916  ;;  %v476_v58 = vadd.f32 %v1415_v45, %v475_v50  ;;  %vm1713_vm8 = vmmov %vm1705_vm7 }
  0x82   : > { %v266_v63 = vmul.f32 %v917_v57, %v1282_v4  ;;  %v267_v1 = vmul.f32 %v917_v57, %v1289_v7  ;;  %v268_v6 = vmul.f32 %v917_v57, %v1296_v11  ;;  %v269_v10 = vmul.f32 %v917_v57, %v1302_v14  ;;  %vm1714_vm10 = vmmov %vm1705_vm7 }
  0x83   : > { %922 = vrcp.f32 %v476_v58  ;;  %v1496_v4 = vsel %vm1422_vm5, 1.0, %v1076_v46  ;;  %v1501_v7 = vsel %vm1433_vm14, 1.0, %v1076_v46  ;;  %v1516_v14 = vsel %vm1453_vm3, 1.0, %v1076_v46  ;;  %vm1709_vm5 = vmmov %vm1707_vm0 }
  0x84   : > { %v284_v2 = vsel %vm1706_vm12, %v266_v63, 0.0  ;;  %v285_v11 = vsel %vm1707_vm0, %v267_v1, 0.0  ;;  %v286_v13 = vsel %vm1708_vm4, %v268_v6, 0.0  ;;  %v287_v8 = vsel %vm1709_vm5, %v269_v10, 0.0  ;;  %vm1712_vm3 = vmmov %vm1711_vm1 }
  0x85   : > { %v919_v17 = vpop.eup %918  ;;  %v308_v20 = vadd.f32 %v781_v47, %v284_v2  ;;  %v296_v24 = vmul.f32 %v781_v47, %v284_v2  ;;  %v297_v31 = vmul.f32 %v782_v55, %v285_v11  ;;  %v309_v32 = vadd.f32 %v782_v55, %v285_v11  ;;  %vm1715_vm11 = vmmov %vm1705_vm7 }
  0x86   : > { %v336_v26 = vmul.f32 %v919_v17, %v1309_v16  ;;  %v337_v27 = vmul.f32 %v919_v17, %v1314_v18  ;;  %v298_v33 = vmul.f32 %v783_v0, %v286_v13  ;;  %v338_v54 = vmul.f32 %v919_v17, %v1318_v19  ;;  %vm1717_vm15 = vmmov %vm1716_vm13 }
  0x87   : > { %vm485_vm14 = vcmp.eq.s32.totalorder %v1298_v12, 3  ;;  %v310_v38 = vadd.f32 %v783_v0, %v286_v13  ;;  %v299_v16 = vmul.f32 %v784_v21, %v287_v8  ;;  %v311_v44 = vadd.f32 %v784_v21, %v287_v8  ;;  %vm1718_vm2 = vmmov %vm1716_vm13 }
  0x88   : > { %v355_v35 = vsel %vm1710_vm6, %v336_v26, 0.0  ;;  %v356_v37 = vsel %vm1711_vm1, %v337_v27, 0.0  ;;  %v357_v48 = vsel %vm1712_vm3, %v338_v54, 0.0  ;;  %vm1719_vm7 = vmmov %vm1711_vm1  ;;  %vm584_vm5 = vcmask 1041409  }
  0x89   : > { %v921_v40 = vpop.eup %920  ;;  %v367_v18 = vmul.f32 %v789_v49, %v355_v35  ;;  %v375_v42 = vadd.f32 %v355_v35, %v308_v20  ;;  %v368_v43 = vmul.f32 %v1462_v59, %v356_v37  ;;  %v376_v55 = vadd.f32 %v356_v37, %v309_v32  ;;  %vm1720_vm9 = vmmov %vm1718_vm2 }
  0x8a   : > { %v407_v47 = vmul.f32 %v921_v40, %v1342_v25  ;;  %v408_v19 = vmul.f32 %v921_v40, %v1354_v28  ;;  %v409_v50 = vmul.f32 %v921_v40, %v1363_v30  ;;  %v369_v57 = vmul.f32 %v1496_v4, %v357_v48  ;;  %vm496_vm12 = vmand %vm485_vm14, %vm1720_vm9 }
  0x8b   : > { %v371_v51 = vadd.f32 %v367_v18, %v296_v24  ;;  %v379_v56 = vadd.f32 %v789_v49, %v375_v42  ;;  %v339_v28 = vmul.f32 %v919_v17, %v1332_v23  ;;  %v372_v30 = vadd.f32 %v368_v43, %v297_v31  ;;  %vm1721_vm0 = vmmov %vm1713_vm8 }
  0x8c   : > { %v426_v58 = vsel %vm1713_vm8, %v407_v47, 0.0  ;;  %v427_v62 = vsel %vm1714_vm10, %v408_v19, 0.0  ;;  %v428_v25 = vsel %vm1715_vm11, %v409_v50, 0.0  ;;  %v373_v2 = vadd.f32 %v369_v57, %v298_v33  ;;  %vm1722_vm4 = vmmov %vm1718_vm2 }
  0x8d   : > { %v923_v63 = vpop.eup %922  ;;  %v438_v1 = vmul.f32 %v1441_v52, %v426_v58  ;;  %v439_v6 = vmul.f32 %v1467_v60, %v427_v62  ;;  %v446_v49 = vadd.f32 %v426_v58, %v379_v56  ;;  %v440_v8 = vmul.f32 %v1501_v7, %v428_v25 }
  0x8e   : > { %v478_v10 = vmul.f32 %v923_v63, %v1384_v36  ;;  %v479_v0 = vmul.f32 %v923_v63, %v1394_v39  ;;  %v480_v11 = vmul.f32 %v923_v63, %v1403_v41  ;;  %v380_v23 = vadd.f32 %v1462_v59, %v376_v55 }
  0x8f   : > { %v442_v13 = vadd.f32 %v438_v1, %v371_v51  ;;  %v450_v20 = vadd.f32 %v1441_v52, %v446_v49  ;;  %v377_v24 = vadd.f32 %v357_v48, %v310_v38  ;;  %v443_v41 = vadd.f32 %v439_v6, %v372_v30 }
  0x90   : > { %v497_v17 = vsel %vm1716_vm13, %v478_v10, 0.0  ;;  %v498_v21 = vsel %vm1717_vm15, %v479_v0, 0.0  ;;  %v499_v36 = vsel %vm1718_vm2, %v480_v11, 0.0  ;;  %v447_v27 = vadd.f32 %v427_v62, %v380_v23 }
  0x91   : > { %v509_v39 = vmul.f32 %v1446_v53, %v497_v17  ;;  %v510_v26 = vmul.f32 %v1472_v61, %v498_v21  ;;  %v517_v52 = vadd.f32 %v497_v17, %v450_v20  ;;  %v358_v59 = vsel %vm1719_vm7, %v339_v28, 0.0 }
  0x92   : > { %v410_v31 = vmul.f32 %v921_v40, %v1375_v34  ;;  %v481_v32 = vmul.f32 %v923_v63, %v1415_v45  ;;  %v444_v35 = vadd.f32 %v440_v8, %v373_v2  ;;  %v511_v37 = vmul.f32 %v1516_v14, %v499_v36 }
  0x93   : > { %v513_v33 = vadd.f32 %v509_v39, %v442_v13  ;;  %v521_v54 = vadd.f32 %v1446_v53, %v517_v52  ;;  %v451_v38 = vadd.f32 %v1467_v60, %v447_v27  ;;  %v370_v5 = vmul.f32 %v1524_v22, %v358_v59 }
  0x94   : > { %v378_v18 = vadd.f32 %v358_v59, %v311_v44  ;;  %v429_v34 = vsel %vm1721_vm0, %v410_v31, 0.0  ;;  %v514_v45 = vadd.f32 %v510_v26, %v443_v41  ;;  %v808_v40 = vsel %vm496_vm12, 1.0, %v1076_v46 }
  0x95   : > { %556 = vadd.xlane.f32.xlu0 %v513_v33  ;;  %599 = vadd.xlane.f32.xlu1 %v521_v54  ;;  %v441_v12 = vmul.f32 %v1529_v29, %v429_v34  ;;  %v381_v53 = vadd.f32 %v1496_v4, %v377_v24  ;;  %v518_v42 = vadd.f32 %v498_v21, %v451_v38  ;;  %v500_v60 = vsel %vm1722_vm4, %v481_v32, 0.0 }
  0x96   : > { %v374_v43 = vadd.f32 %v370_v5, %v299_v16  ;;  %v382_v47 = vadd.f32 %v1524_v22, %v378_v18  ;;  %v515_v48 = vadd.f32 %v511_v37, %v444_v35  ;;  %v512_v51 = vmul.f32 %v808_v40, %v500_v60 }
  0x97   : > { %v448_v44 = vadd.f32 %v428_v25, %v381_v53  ;;  %v522_v9 = vadd.f32 %v1472_v61, %v518_v42  ;;  %vm586_vm14 = vcmask 1042434   ;;  %vm588_vm6 = vcmask 1043459  }
  0x98   : > { %v449_v19 = vadd.f32 %v429_v34, %v382_v47  ;;  %v445_v50 = vadd.f32 %v441_v12, %v374_v43  ;;  %vm591_vm1 = vcmask 60416   ;;  %vm640_vm3 = vcmask 24576  }
  0x99   : > { %558 = vadd.xlane.f32.xlu0 %v514_v45  ;;  %v452_v55 = vadd.f32 %v1501_v7, %v448_v44  ;;  %601 = vadd.xlane.f32.xlu1 %v522_v9 }
  0x9a   : > { %v453_v46 = vadd.f32 %v1529_v29, %v449_v19  ;;  %v516_v15 = vadd.f32 %v512_v51, %v445_v50 }
  0x9b   : > { %v519_v4 = vadd.f32 %v499_v36, %v452_v55 }
  0x9c   : > { %v520_v16 = vadd.f32 %v500_v60, %v453_v46 }
  0x9d   : > { %560 = vadd.xlane.f32.xlu0 %v515_v48  ;;  %v523_v56 = vadd.f32 %v1516_v14, %v519_v4 }
  0x9e   : > { %v524_v22 = vadd.f32 %v808_v40, %v520_v16 }
  0x9f   : > { %603 = vadd.xlane.f32.xlu1 %v523_v56 }
  0xa1   : > { %562 = vadd.xlane.f32.xlu0 %v516_v15 }
  0xa3   : > { %605 = vadd.xlane.f32.xlu1 %v524_v22 }
 0x122   : > { %v557_v61 = vpop.xlane.xlu0 %556  ;;  %v600_v57 = vpop.xlane.xlu1 %599 }
 0x123   : > { %v571_v25 = vrot.slane %v557_v61, %v1259_v3  ;;  %v614_v49 = vrot.slane %v600_v57, %v1259_v3 }
 0x126   : > { %v559_v58 = vpop.xlane.xlu0 %558  ;;  %v602_v62 = vpop.xlane.xlu1 %601 }
 0x127   : > { %v575_v7 = vrot.slane %v559_v58, %v1259_v3  ;;  %v618_v14 = vrot.slane %v602_v62, %v1259_v3 }
 0x129   : > { %v585_v1 = vsel %vm584_vm5, %v575_v7, %v571_v25  ;;  %v627_v11 = vsel %vm584_vm5, %v618_v14, %v614_v49 }
 0x12a   : > { %v561_v29 = vpop.xlane.xlu0 %560 }
 0x12b   : > { %v579_v28 = vrot.slane %v561_v29, %v1259_v3 }
 0x12c   : > { %v604_v63 = vpop.xlane.xlu1 %603 }
 0x12d   : > { %v622_v6 = vrot.slane %v604_v63, %v1259_v3  ;;  %v587_v0 = vsel %vm586_vm14, %v579_v28, %v585_v1 }
 0x12e   : > { %v563_v30 = vpop.xlane.xlu0 %562 }
 0x12f   : > { %v583_v10 = vrot.slane %v563_v30, %v1259_v3  ;;  %v628_v23 = vsel %vm586_vm14, %v622_v6, %v627_v11 }
 0x130   : > { %v606_v2 = vpop.xlane.xlu1 %605 }
 0x131   : > { %v589_v13 = vsel %vm588_vm6, %v583_v10, %v587_v0  ;;  %v626_v20 = vrot.slane %v606_v2, %v1259_v3 }
 0x132   : > { %v592_v8 = vsel %vm591_vm1, %v589_v13, 0.0 }
 0x133   : > { %593 = vadd.xlane.f32.xlu0 %v592_v8  ;;  %v629_v17 = vsel %vm588_vm6, %v626_v20, %v628_v23 }
 0x134   : > { %v631_v21 = vsel %vm591_vm1, %v629_v17, 0.0 }
 0x135   : > { %632 = vadd.xlane.f32.xlu1 %v631_v21 }
 0x1c0   : > { %v594_v24 = vpop.xlane.xlu0 %593 }
 0x1c1   : > { %v638_v36 = vrot.slane %v594_v24, %v1259_v3 }
 0x1c2   : > { %v633_v39 = vpop.xlane.xlu1 %632 }
 0x1c3   : > { %v646_v41 = vrot.slane %v633_v39, %v1259_v3  ;;  %641 = vst.msk [vmem:[%s217_s30] sm:$0x1] %vm640_vm3, %v638_v36 }
 0x1c5   : > { %648 = vst.msk [vmem:[%s217_s30 + $0x1] sm:$0x1] %vm640_vm3, %v646_v41 }
 0x1c6   : > { %997 = shalt.err (!%p994_p9)
}
 0x1c7   : > { %s998_s18 = scalar_lea.hbm %s1606_s3, 32  ;;  %s1002_s6 = scalar_lea.hbm %s1657_s2, 64 }
 0x1c8   : > { %p999_p1 = scmp.ne.s32.totalorder %s1606_s3, %s998_s18  ;;  %p1003_p5 = scmp.lt.u32.totalorder %s1606_s3, %s1657_s2 }
 0x1c9   : > { %p1004_p13 = scmp.lt.u32.totalorder %s1002_s6, %s998_s18  ;;  %p1006_p0 = scmp.lt.u32.totalorder %s998_s18, %s1606_s3 }
 0x1ca   : > { %p1000_p6 = pnand %p999_p1, %p1723_p3 }
 0x1cb   : > { %p1005_p8 = por %p1004_p13, %p1003_p5 }
 0x1cc   : > { %p1001_p2 = pneg %p1000_p6 }
 0x1cd   : > { %p1007_p11 = por %p1006_p0, %p1005_p8 }
 0x1cf   : > { %p1008_p4 = pnand %p1007_p11, %p1001_p2 }
 0x1d1   : > { %1011 = shalt.err (!%p1008_p4)
}
 0x1d2   : > { %818 = dma.vmem_to_hbm [thread:$0]  (%p1723_p3), %s1608_s27, 32, %s1606_s3, %s650_s12  }
 0x1d3 PF: > { %s675_s19 = sand.u32 1, %s1050_s9   ;;  %p1724_p7 = scmp.ne.s32.totalorder %s1667_s24, 0 }
 0x1d4   : > { %p1725_p10 = scmp.ge.s32.totalorder %s1070_s14, 2  ;;  %s676_s21 = scalar_lea.sflag [#allocation6], %s675_s19 }
 0x1d6   : > { %p828_p12 = pnand %p1725_p10, %p1724_p7 }
 0x1d8   : > { %1045 = dma.done.wait (!%p828_p12), %s676_s21, 32  }
 0x1d9   : > { %1047 = vsyncadd (!%p828_p12), %s676_s21, 4294967264  ;;  %s21_s14 = sadd.s32 1, %s1070_s14   ;;  %s1726_s9 = smov %s1054_s10 }
 0x1da   : > { %p18_p9 = scmp.ge.s32.totalorder %s21_s14, 4   ;;  %s1727_s10 = smov %s1058_s11 }
 0x1db   : > { %s1728_s11 = smov %s1149_s23  ;;  %s1729_s12 = smov %s1066_s13 }
 0x1dc   : > { %s1730_s13 = smov %s1732_s17  ;;  %20 = sbr.rel (!%p18_p9) target bundleno = 8 (0x8), region = 97 }
 0x1e3   :  { %681 = vsyncpa [#allocation5], 1 }
 0x1e4   :  { %683 = vsyncpa [#allocation5 + $0x1], 1 }
 0x1e5   :  { %684 = vsyncpa [#allocation8], 1 }
 0x1e6   :  { %686 = vsyncpa [#allocation8 + $0x1], 1 }
 0x1e7   :  { %687 = vsyncpa [#allocation6], 1 }
 0x1e8   :  { %689 = vsyncpa [#allocation6 + $0x1], 1 }

</bundles_post_ra>
